<compile_context>
chip_gen: v5e
topology: v5e:2x2
jax: 0.10.0
libtpu: 0.0.40
codegen_flags: <defaults>
</compile_context>

<pallas_src>
import functools

import jax
import jax.numpy as jnp
from jax.experimental import pallas as pl
from jax.experimental.pallas import tpu as pltpu


def _seg_ce_kernel(logits_ref, tgt_ref, out_ref, acc_ref, *, n_cols):
    """Per-batch segmentation cross-entropy; classes on sublanes, spatial on lanes.

    logits_ref: (C, tile_cols) float block   (classes x spatial positions)
    tgt_ref:    (1, tile_cols) int32 block
    out_ref:    (1, 128)       per-batch partial sum (lane 0 carries the value)
    acc_ref:    (1, tile_cols) f32 running per-column loss accumulator (scratch)
    """
    t = pl.program_id(1)
    n_t = pl.num_programs(1)
    n_classes, tile_cols = logits_ref.shape

    @pl.when(t == 0)
    def _():
        acc_ref[...] = jnp.zeros_like(acc_ref)

    logits = logits_ref[...].astype(jnp.float32)            # (C, tile_cols)
    tgt = tgt_ref[...].astype(jnp.int32)                     # (1, tile_cols)

    # Mask for columns past the end of the spatial extent (partial last tile).
    col = jax.lax.broadcasted_iota(jnp.int32, (1, tile_cols), 1) + t * tile_cols
    valid = col < n_cols                                      # (1, tile_cols)

    # Per-class rows with garbage columns forced to 0 so exp() stays finite.
    rows = [jnp.where(valid, logits[c:c + 1, :], 0.0) for c in range(n_classes)]

    # Unrolled class loop: pure per-lane VPU work (plus EUP exp/log).
    m = rows[0]
    for r in rows[1:]:
        m = jnp.maximum(m, r)
    s = jnp.exp(rows[0] - m)
    tgt_logit = jnp.where(tgt == 0, rows[0], 0.0)
    for c in range(1, n_classes):
        s = s + jnp.exp(rows[c] - m)
        tgt_logit = tgt_logit + jnp.where(tgt == c, rows[c], 0.0)

    per_col = m + jnp.log(s) - tgt_logit                      # (1, tile_cols)
    acc_ref[...] += jnp.where(valid, per_col, 0.0)

    @pl.when(t == n_t - 1)
    def _():
        total = jnp.sum(acc_ref[...])                         # one XLU reduce per batch
        lane = jax.lax.broadcasted_iota(jnp.int32, (1, 128), 1)
        out_ref[...] = jnp.where(lane == 0, total, 0.0)


def seg_cross_entropy_mean(seg_logits, seg_targets, *, max_tile_cols=8192):
    """Mean pixel-wise CE.  seg_logits: [B, C, H, W]; seg_targets: [B, 1, H, W] int."""
    assert max_tile_cols % 128 == 0
    b, c, h, w = seg_logits.shape
    hw = h * w

    # Zero-copy reshapes — no transpose, no padding pass over HBM.
    logits = seg_logits.reshape(b, c, hw)
    targets = seg_targets.reshape(b, 1, hw).astype(jnp.int32)

    if hw <= max_tile_cols:
        tile_cols = hw                  # full spatial extent: always a legal block dim
    else:
        tile_cols = max_tile_cols       # multiple of 128; edge tile masked in-kernel
    n_tiles = pl.cdiv(hw, tile_cols)

    kernel = functools.partial(_seg_ce_kernel, n_cols=hw)

    partials = pl.pallas_call(
        kernel,
        out_shape=jax.ShapeDtypeStruct((b, 1, 128), jnp.float32),
        grid_spec=pltpu.PrefetchScalarGridSpec(
            num_scalar_prefetch=0,
            grid=(b, n_tiles),
            in_specs=[
                pl.BlockSpec((None, c, tile_cols), lambda bi, ti: (bi, 0, ti)),
                pl.BlockSpec((None, 1, tile_cols), lambda bi, ti: (bi, 0, ti)),
            ],
            out_specs=pl.BlockSpec((None, 1, 128), lambda bi, ti: (bi, 0, 0)),
            scratch_shapes=[pltpu.VMEM((1, tile_cols), jnp.float32)],
        ),
        compiler_params=pltpu.CompilerParams(
            dimension_semantics=("parallel", "arbitrary")),
    )(logits, targets)

    return jnp.sum(partials) * (1.0 / (b * hw))


def classification_ce_mean(cls_logits, cls_targets):
    """Tiny [B, K] head: plain JAX (a Pallas launch here is pure overhead)."""
    logits = cls_logits.astype(jnp.float32)
    lse = jax.nn.logsumexp(logits, axis=-1)
    picked = jnp.take_along_axis(
        logits, cls_targets.astype(jnp.int32)[:, None], axis=-1)[:, 0]
    return jnp.mean(lse - picked)


def combined_seg_cls_loss(output, target, epoch=0):
    """JAX/Pallas equivalent of CombinedSegmentationClassificationLoss.forward."""
    seg_out = output["seg"]          # [B, C, H, W] float logits (NCHW)
    cls_out = output["class"]        # [B, K]       float logits
    seg_tgt = target["target"]       # [B, 1, H, W] int class map
    cls_tgt = target["class"]        # [B]          int class indices

    loss_seg = seg_cross_entropy_mean(seg_out, seg_tgt)
    loss_cls = classification_ce_mean(cls_out, cls_tgt)

    # epoch-gated classification weight (host-side Python, as in the module)
    if epoch < 10:
        weight = 0.05
    elif epoch < 30:
        weight = 0.15
    else:
        weight = 0.3

    return (1.0 - weight) * loss_seg + weight * loss_cls


if __name__ == "__main__":
    key = jax.random.PRNGKey(0)
    k1, k2, k3, k4 = jax.random.split(key, 4)

    B, C, H, W = 2, 4, 16, 16   # segmentation: 4 classes
    K = 8                       # classification: 8 classes

    seg_logits = jax.random.normal(k1, (B, C, H, W), dtype=jnp.float32)
    cls_logits = jax.random.normal(k2, (B, K), dtype=jnp.float32)
    seg_target = jax.random.randint(k3, (B, 1, H, W), 0, C, dtype=jnp.int32)
    cls_target = jax.random.randint(k4, (B,), 0, K, dtype=jnp.int32)

    output = {"seg": seg_logits, "class": cls_logits}
    target = {"target": seg_target, "class": cls_target}

    loss = combined_seg_cls_loss(output, target, epoch=0)
    jax.block_until_ready(loss)

    # reference (pure JAX)
    def _ref_ce(logits, tgt):
        lse = jax.nn.logsumexp(logits, axis=-1)
        picked = jnp.take_along_axis(logits, tgt[:, None], axis=-1)[:, 0]
        return jnp.mean(lse - picked)

    seg_rows = jnp.transpose(seg_logits, (0, 2, 3, 1)).reshape(B * H * W, C)
    ref = (0.95 * _ref_ce(seg_rows, seg_target.reshape(-1))
           + 0.05 * _ref_ce(cls_logits, cls_target))
    assert jnp.allclose(loss, ref, rtol=1e-5, atol=1e-5), (loss, ref)

    # Second check: multi-tile path with a partial (masked) last tile.
    B2, C2, H2, W2 = 2, 3, 18, 14      # H*W = 252; tile 128 -> 2 tiles, last partial
    s2 = jax.random.normal(k1, (B2, C2, H2, W2), dtype=jnp.float32)
    t2 = jax.random.randint(k3, (B2, 1, H2, W2), 0, C2, dtype=jnp.int32)
    seg2 = seg_cross_entropy_mean(s2, t2, max_tile_cols=128)
    jax.block_until_ready(seg2)
    rows2 = jnp.transpose(s2, (0, 2, 3, 1)).reshape(B2 * H2 * W2, C2)
    ref2 = _ref_ce(rows2, t2.reshape(-1))
    assert jnp.allclose(seg2, ref2, rtol=1e-5, atol=1e-5), (seg2, ref2)

    print("KERNEL_OK")
</pallas_src>

<mosaic_0001>
module attributes {stable_mosaic.version = 11 : i64} {
  func.func @_seg_ce_kernel(%arg0: i32, %arg1: i32, %arg2: memref<1x4x256xf32, #tpu.memory_space<vmem>>, %arg3: memref<1x1x256xi32, #tpu.memory_space<vmem>>, %arg4: memref<1x1x128xf32, #tpu.memory_space<vmem>>, %arg5: memref<1x256xf32, #tpu.memory_space<vmem>>) attributes {dimension_semantics = [#tpu.dimension_semantics<parallel>, #tpu.dimension_semantics<arbitrary>], iteration_bounds = array<i64: 2, 1>, scalar_prefetch = 0 : i64, scratch_operands = 1 : i64, tpu.core_type = #tpu.core_type<tc>, window_params = [{transform_indices = @transform_0, window_bounds = array<i64: 1, 4, 256>}, {transform_indices = @transform_1, window_bounds = array<i64: 1, 1, 256>}, {transform_indices = @transform_2, window_bounds = array<i64: 1, 1, 128>}]} {
    %c0_i32 = arith.constant 0 : i32
    %0 = arith.cmpi eq, %arg1, %c0_i32 : i32
    %1 = arith.extui %0 : i1 to i32
    %c0_i32_0 = arith.constant 0 : i32
    %2 = arith.cmpi ne, %1, %c0_i32_0 : i32
    scf.if %2 {
      %cst_22 = arith.constant 0.000000e+00 : f32
      %69 = vector.broadcast %cst_22 : f32 to vector<1x256xf32>
      %c0_23 = arith.constant 0 : index
      %c0_24 = arith.constant 0 : index
      %70 = vector.load %arg5[%c0_23, %c0_24] : memref<1x256xf32, #tpu.memory_space<vmem>>, vector<1x256xf32>
      tpu.vector_store %arg5[%c0_23, %c0_24], %69 {strides = array<i32>} : memref<1x256xf32, #tpu.memory_space<vmem>>, vector<1x256xf32>,
    } else {
    }
    %c0 = arith.constant 0 : index
    %c0_1 = arith.constant 0 : index
    %c0_2 = arith.constant 0 : index
    %3 = vector.load %arg2[%c0, %c0_1, %c0_2] : memref<1x4x256xf32, #tpu.memory_space<vmem>>, vector<1x4x256xf32>
    %4 = vector.shape_cast %3 : vector<1x4x256xf32> to vector<4x256xf32>
    %c0_3 = arith.constant 0 : index
    %c0_4 = arith.constant 0 : index
    %c0_5 = arith.constant 0 : index
    %5 = vector.load %arg3[%c0_3, %c0_4, %c0_5] : memref<1x1x256xi32, #tpu.memory_space<vmem>>, vector<1x1x256xi32>
    %6 = vector.shape_cast %5 : vector<1x1x256xi32> to vector<1x256xi32>
    %7 = tpu.iota {dimensions = array<i32: 1>} : vector<1x256xi32>
    %c256_i32 = arith.constant 256 : i32
    %8 = arith.muli %arg1, %c256_i32 : i32
    %9 = vector.broadcast %8 : i32 to vector<1x256xi32>
    %10 = arith.addi %7, %9 : vector<1x256xi32>
    %c256_i32_6 = arith.constant 256 : i32
    %11 = vector.broadcast %c256_i32_6 : i32 to vector<1x256xi32>
    %12 = arith.cmpi slt, %10, %11 : vector<1x256xi32>
    %13 = vector.extract_strided_slice %4 {offsets = [0, 0], sizes = [1, 256], strides = [1, 1]} : vector<4x256xf32> to vector<1x256xf32>
    %cst = arith.constant 0.000000e+00 : f32
    %14 = vector.broadcast %cst : f32 to vector<1x256xf32>
    %15 = arith.select %12, %13, %14 : vector<1x256xi1>, vector<1x256xf32>
    %16 = vector.extract_strided_slice %4 {offsets = [1, 0], sizes = [1, 256], strides = [1, 1]} : vector<4x256xf32> to vector<1x256xf32>
    %cst_7 = arith.constant 0.000000e+00 : f32
    %17 = vector.broadcast %cst_7 : f32 to vector<1x256xf32>
    %18 = arith.select %12, %16, %17 : vector<1x256xi1>, vector<1x256xf32>
    %19 = vector.extract_strided_slice %4 {offsets = [2, 0], sizes = [1, 256], strides = [1, 1]} : vector<4x256xf32> to vector<1x256xf32>
    %cst_8 = arith.constant 0.000000e+00 : f32
    %20 = vector.broadcast %cst_8 : f32 to vector<1x256xf32>
    %21 = arith.select %12, %19, %20 : vector<1x256xi1>, vector<1x256xf32>
    %22 = vector.extract_strided_slice %4 {offsets = [3, 0], sizes = [1, 256], strides = [1, 1]} : vector<4x256xf32> to vector<1x256xf32>
    %cst_9 = arith.constant 0.000000e+00 : f32
    %23 = vector.broadcast %cst_9 : f32 to vector<1x256xf32>
    %24 = arith.select %12, %22, %23 : vector<1x256xi1>, vector<1x256xf32>
    %25 = arith.maximumf %15, %18 : vector<1x256xf32>
    %26 = arith.maximumf %25, %21 : vector<1x256xf32>
    %27 = arith.maximumf %26, %24 : vector<1x256xf32>
    %28 = arith.subf %15, %27 : vector<1x256xf32>
    %29 = math.exp %28 : vector<1x256xf32>
    %c0_i32_10 = arith.constant 0 : i32
    %30 = vector.broadcast %c0_i32_10 : i32 to vector<1x256xi32>
    %31 = arith.cmpi eq, %6, %30 : vector<1x256xi32>
    %cst_11 = arith.constant 0.000000e+00 : f32
    %32 = vector.broadcast %cst_11 : f32 to vector<1x256xf32>
    %33 = arith.select %31, %15, %32 : vector<1x256xi1>, vector<1x256xf32>
    %34 = arith.subf %18, %27 : vector<1x256xf32>
    %35 = math.exp %34 : vector<1x256xf32>
    %36 = arith.addf %29, %35 : vector<1x256xf32>
    %c1_i32 = arith.constant 1 : i32
    %37 = vector.broadcast %c1_i32 : i32 to vector<1x256xi32>
    %38 = arith.cmpi eq, %6, %37 : vector<1x256xi32>
    %cst_12 = arith.constant 0.000000e+00 : f32
    %39 = vector.broadcast %cst_12 : f32 to vector<1x256xf32>
    %40 = arith.select %38, %18, %39 : vector<1x256xi1>, vector<1x256xf32>
    %41 = arith.addf %33, %40 : vector<1x256xf32>
    %42 = arith.subf %21, %27 : vector<1x256xf32>
    %43 = math.exp %42 : vector<1x256xf32>
    %44 = arith.addf %36, %43 : vector<1x256xf32>
    %c2_i32 = arith.constant 2 : i32
    %45 = vector.broadcast %c2_i32 : i32 to vector<1x256xi32>
    %46 = arith.cmpi eq, %6, %45 : vector<1x256xi32>
    %cst_13 = arith.constant 0.000000e+00 : f32
    %47 = vector.broadcast %cst_13 : f32 to vector<1x256xf32>
    %48 = arith.select %46, %21, %47 : vector<1x256xi1>, vector<1x256xf32>
    %49 = arith.addf %41, %48 : vector<1x256xf32>
    %50 = arith.subf %24, %27 : vector<1x256xf32>
    %51 = math.exp %50 : vector<1x256xf32>
    %52 = arith.addf %44, %51 : vector<1x256xf32>
    %c3_i32 = arith.constant 3 : i32
    %53 = vector.broadcast %c3_i32 : i32 to vector<1x256xi32>
    %54 = arith.cmpi eq, %6, %53 : vector<1x256xi32>
    %cst_14 = arith.constant 0.000000e+00 : f32
    %55 = vector.broadcast %cst_14 : f32 to vector<1x256xf32>
    %56 = arith.select %54, %24, %55 : vector<1x256xi1>, vector<1x256xf32>
    %57 = arith.addf %49, %56 : vector<1x256xf32>
    %58 = math.log %52 : vector<1x256xf32>
    %59 = arith.addf %27, %58 : vector<1x256xf32>
    %60 = arith.subf %59, %57 : vector<1x256xf32>
    %c0_15 = arith.constant 0 : index
    %c0_16 = arith.constant 0 : index
    %61 = vector.load %arg5[%c0_15, %c0_16] : memref<1x256xf32, #tpu.memory_space<vmem>>, vector<1x256xf32>
    %cst_17 = arith.constant 0.000000e+00 : f32
    %62 = vector.broadcast %cst_17 : f32 to vector<1x256xf32>
    %63 = arith.select %12, %60, %62 : vector<1x256xi1>, vector<1x256xf32>
    %64 = arith.addf %61, %63 : vector<1x256xf32>
    %c0_18 = arith.constant 0 : index
    %c0_19 = arith.constant 0 : index
    %65 = vector.load %arg5[%c0_18, %c0_19] : memref<1x256xf32, #tpu.memory_space<vmem>>, vector<1x256xf32>
    tpu.vector_store %arg5[%c0_18, %c0_19], %64 {strides = array<i32>} : memref<1x256xf32, #tpu.memory_space<vmem>>, vector<1x256xf32>,
    %c0_i32_20 = arith.constant 0 : i32
    %66 = arith.cmpi eq, %arg1, %c0_i32_20 : i32
    %67 = arith.extui %66 : i1 to i32
    %c0_i32_21 = arith.constant 0 : i32
    %68 = arith.cmpi ne, %67, %c0_i32_21 : i32
    scf.if %68 {
      %c0_22 = arith.constant 0 : index
      %c0_23 = arith.constant 0 : index
      %69 = vector.load %arg5[%c0_22, %c0_23] : memref<1x256xf32, #tpu.memory_space<vmem>>, vector<1x256xf32>
      %70 = vector.shape_cast %69 : vector<1x256xf32> to vector<1x1x256xf32>
      %cst_24 = arith.constant dense<0.000000e+00> : vector<1xf32>
      %71 = vector.multi_reduction <add>, %70, %cst_24 [1, 2] : vector<1x1x256xf32> to vector<1xf32>
      %72 = vector.shape_cast %71 : vector<1xf32> to vector<1x1x1xf32>
      %73 = vector.extract %72[0, 0, 0] : f32 from vector<1x1x1xf32>
      %74 = tpu.iota {dimensions = array<i32: 1>} : vector<1x128xi32>
      %c0_i32_25 = arith.constant 0 : i32
      %75 = vector.broadcast %c0_i32_25 : i32 to vector<1x128xi32>
      %76 = arith.cmpi eq, %74, %75 : vector<1x128xi32>
      %cst_26 = arith.constant 0.000000e+00 : f32
      %77 = vector.broadcast %73 : f32 to vector<1x128xf32>
      %78 = vector.broadcast %cst_26 : f32 to vector<1x128xf32>
      %79 = arith.select %76, %77, %78 : vector<1x128xi1>, vector<1x128xf32>
      %c0_27 = arith.constant 0 : index
      %c0_28 = arith.constant 0 : index
      %c0_29 = arith.constant 0 : index
      %80 = vector.load %arg4[%c0_27, %c0_28, %c0_29] : memref<1x1x128xf32, #tpu.memory_space<vmem>>, vector<1x1x128xf32>
      %81 = vector.shape_cast %80 : vector<1x1x128xf32> to vector<1x128xf32>
      %82 = vector.shape_cast %79 : vector<1x128xf32> to vector<1x1x128xf32>
      tpu.vector_store %arg4[%c0_27, %c0_28, %c0_29], %82 {strides = array<i32>} : memref<1x1x128xf32, #tpu.memory_space<vmem>>, vector<1x1x128xf32>,
    } else {
    }
    return
  }
  func.func @transform_0(%arg0: i32, %arg1: i32) -> (i32, i32, i32) {
    %c0_i32 = arith.constant 0 : i32
    %c0_i32_0 = arith.constant 0 : i32
    return %arg0, %c0_i32, %arg1 : i32, i32, i32
  }
  func.func @transform_1(%arg0: i32, %arg1: i32) -> (i32, i32, i32) {
    %c0_i32 = arith.constant 0 : i32
    %c0_i32_0 = arith.constant 0 : i32
    return %arg0, %c0_i32, %arg1 : i32, i32, i32
  }
  func.func @transform_2(%arg0: i32, %arg1: i32) -> (i32, i32, i32) {
    %c0_i32 = arith.constant 0 : i32
    %c0_i32_0 = arith.constant 0 : i32
    %c0_i32_1 = arith.constant 0 : i32
    return %arg0, %c0_i32, %c0_i32_0 : i32, i32, i32
  }
}

</mosaic_0001>

<bundles_post_ra>
// kernel: tpu_custom_call.1
= control target key start
LH: loop header
LB: loop body
LE: loop exit
PB: predicated region body
PF: predicated region fallthrough
CT: control target
= control target key end

     0   :  { %7 = vsyncpa [#allocation4], 0  ;;  %s954_s0 = inlined_call_operand.hbm [shape: f32[2,4,256], index: 0, kind: input, shape index: {}]   ;;  %s955_s1 = inlined_call_operand.hbm [shape: s32[2,1,256], index: 1, kind: input, shape index: {}]   ;;  %s956_s2 = inlined_call_operand.hbm [shape: f32[2,1,128], index: 2, kind: output, shape index: {}]  }
   0x1   :  { %9 = vsyncpa [#allocation4 + $0x1], 0 }
   0x2   :  { %10 = vsyncpa [#allocation7], 0 }
   0x3   :  { %12 = vsyncpa [#allocation7 + $0x1], 0 }
   0x4   :  { %13 = vsyncpa [#allocation5], 0 }
   0x5   :  { %15 = vsyncpa [#allocation5 + $0x1], 0  ;;  %s771_s9 = smov 0   ;;  %s773_s10 = smov 0  }
   0x6   :  { %s775_s11 = smov 0   ;;  %s777_s12 = smov 0  }
   0x7   :  { %s779_s13 = smov 0   ;;  %s781_s14 = smov 0  }
   0x8 LB: > { %s502_s15 = sadd.s32 4294967295, %s753_s14   ;;  %s503_s16 = sadd.s32 4294967294, %s753_s14   ;;  %s753_s14 = sphi %s781_s14, %s21_s14   ;;  %s749_s13 = sphi %s779_s13, %s968_s13   ;;  %s745_s12 = sphi %s777_s12, %s967_s12   ;;  %s741_s11 = sphi %s775_s11, %s966_s11   ;;  %s737_s10 = sphi %s773_s10, %s965_s10   ;;  %s733_s9 = sphi %s771_s9, %s964_s9  }
   0x9   : > { %s33_s17 = sadd.s32 1, %s749_s13  ;;  %s42_s18 = sadd.s32 1, %s741_s11 }
   0xa   : > { %p35_p0 = scmp.ge.s32.totalorder %s33_s17, 2  ;;  %p49_p1 = scmp.ne.s32.totalorder %s741_s11, %s737_s10 }
   0xb   : > { %p50_p2 = scmp.eq.s32.totalorder %s753_s14, 0  ;;  %p55_p3 = scmp.ne.s32.totalorder %s737_s10, %s733_s9 }
   0xc   : > { %s970_s17 = smov (%p35_p0, %s33_s17), 0  ;;  %p56_p5 = scmp.eq.s32.totalorder %s502_s15, 0 }
   0xd   : > { %p812_p4 = por %p50_p2, %p49_p1  ;;  %s37_s20 = ssub.s32 %s749_s13, %s970_s17 }
   0xe   : > { %p107_p6 = scmp.eq.s32.totalorder %s502_s15, 1  ;;  %p40_p7 = scmp.eq.s32.totalorder %s37_s20, 0 }
   0xf   : > { %p818_p8 = por %p56_p5, %p55_p3  ;;  %p113_p10 = scmp.eq.s32.totalorder %s503_s16, 1 }
  0x10   : > { %p822_p9 = por %p107_p6, %p49_p1  ;;  %p505_p12 = scmp.ge.s32.totalorder %s753_s14, 2 }
  0x11   : > { %s827_s23 = scalar_select %p40_p7, %s741_s11, %s42_s18  }
  0x12   : > { %p829_p11 = por %p113_p10, %p55_p3  ;;  %p536_p13 = scmp.lt.s32.totalorder %s753_s14, 2 }
  0x13   : > { %s133_s25 = sand.u32 1, %s741_s11   ;;  %s516_s27 = sshll.u32 %s749_s13, 3 }
  0x14   : > { %s506_s26 = sshll.u32 %s133_s25, 3  ;;  %s144_s30 = scalar_lea.hbm %s954_s0, %s516_s27 }
  0x15   : > { %s137_s3 = scalar_lea.vmem [#allocation3], %s506_s26  ;;  %s146_s5 = sshll.u32 %s144_s30, 4  ;;  %s147_s5 = int_to_ptr.hbm [resolvable:$true] %s146_s5 }
  0x16   : > { %s148_s4 = sshll.u32 %s137_s3, 4  ;;  %p842_p0 = pnand %p536_p13, %p812_p4  ;;  %s149_s4 = int_to_ptr.vmem [resolvable:$true] %s148_s4 }
  0x17   : > { %p511_p1 = scmp.ge.s32.totalorder %s753_s14, 1  ;;  %p174_p2 = scmp.lt.s32.totalorder %s753_s14, 3 }
  0x18   : > { %s134_s7 = scalar_lea.sflag [#allocation4], %s133_s25  ;;  %s509_s8 = sshll.u32 %s133_s25, 1 }
  0x19   : > { %528 = dma.hbm_to_vmem [thread:$0]  (!%p842_p0), %s147_s5, 128, %s149_s4, %s134_s7  }
  0x1a   : > { %p175_p3 = pnand %p511_p1, %p174_p2  ;;  %s510_s15 = sshll.u32 %s749_s13, 1 }
  0x1b   : > { %s165_s20 = scalar_lea.hbm %s955_s1, %s510_s15  ;;  %s159_s26 = scalar_lea.vmem [#allocation6], %s509_s8 }
  0x1c   : > { %s169_s19 = sshll.u32 %s159_s26, 4  ;;  %s167_s27 = sshll.u32 %s165_s20, 4  ;;  %s170_s19 = int_to_ptr.vmem [resolvable:$true] %s169_s19  ;;  %s168_s27 = int_to_ptr.hbm [resolvable:$true] %s167_s27 }
  0x1d   : > { %s156_s28 = scalar_lea.sflag [#allocation7], %s133_s25  ;;  %178 = sbr.rel (%p175_p3) target bundleno = 281 (0x119), region = 28 }
  0x1e   : > { %531 = dma.hbm_to_vmem [thread:$0]  (!%p842_p0), %s168_s27, 32, %s170_s19, %s156_s28  }
  0x1f   : > { %s857_s29 = sand.u32 (!%p175_p3), 1, %s737_s10  }
  0x20   : > { %s512_s30 = sshll.u32 (!%p175_p3), %s857_s29, 3  ;;  %s181_s3 = scalar_lea.sflag (!%p175_p3), [#allocation4], %s857_s29 }
  0x21   : > { %s184_s4 = scalar_lea.vmem (!%p175_p3), [#allocation3], %s512_s30 }
  0x22   : > { %720 = dma.done.wait (%p818_p8), %s181_s3, 128  }
  0x23   : > { %722 = vsyncadd (%p818_p8), %s181_s3, 4294967168  ;;  %s513_s25 = sshll.u32 %s857_s29, 1  ;;  %s191_s5 = scalar_lea.sflag [#allocation7], %s857_s29 }
  0x24   : > { %s867_s6 = scalar_lea.vmem [#allocation6], %s513_s25 }
  0x25   : > { %724 = dma.done.wait (%p818_p8), %s191_s5, 32  }
  0x26   : > { %726 = vsyncadd (%p818_p8), %s191_s5, 4294967264  ;;  %v226_v0 = vlaneseq  ;;  %v755_v2 = vmov 0.0   ;;  %v231_v3 = vld [vmem:[%s184_s4] sm:$0xff]  ;;  %v232_v31 = vld [vmem:[%s867_s6] sm:$0x3]  ;;  %vm283_vm1 = vcmask 1040384   ;;  %s396_s8 = scalar_lea.hbm %s956_s2, %s745_s12 }
  0x27   : > { %v243_v4 = vperm.slane %v231_v3, 0  ;;  %v244_v5 = vperm.slane %v231_v3, 4  ;;  %v249_v6 = vperm.slane %v231_v3, 1  ;;  %v250_v7 = vperm.slane %v231_v3, 5  ;;  %s219_s15 = scalar_lea.vmem [#allocation8], %s857_s29  ;;  %s400_s18 = sshll.u32 %s396_s8, 4  ;;  %s401_s18 = int_to_ptr.hbm [resolvable:$true] %s400_s18 }
  0x28   : > { %vm874_vm0 = vcmp.lt.s32.totalorder %v226_v0, 256  ;;  %v255_v8 = vperm.slane %v231_v3, 2  ;;  %v256_v9 = vperm.slane %v231_v3, 6  ;;  %v880_v10 = vperm.slane %v231_v3, 3  ;;  %s398_s16 = sshll.u32 %s219_s15, 4  ;;  %s388_s26 = scalar_lea.sflag [#allocation5], %s857_s29  ;;  %s399_s16 = int_to_ptr.vmem [resolvable:$true] %s398_s16 }
  0x29   : > { %230 = vst.msk [vmem:[#allocation2] sm:$0x3] %vm874_vm0, %v755_v2  ;;  %v882_v11 = vperm.slane %v231_v3, 7  ;;  %v267_v12 = vmax.f32 %v243_v4, %v249_v6  ;;  %v268_v13 = vmax.f32 %v244_v5, %v250_v7  ;;  %v282_v32 = vrot.slane %v244_v5, 7  ;;  %s681_s19 = sshra.s32 %s401_s18, 4  ;;  %s687_s30 = scalar_lea.hbm %s956_s2, 2  ;;  %s682_s19 = int_to_ptr.hbm [resolvable:$true] %s681_s19 }
  0x2a   : > { %v298_v33 = vrot.slane %v250_v7, 7  ;;  %vm279_vm2 = vcmp.eq.s32.totalorder %v232_v31, 0  ;;  %vm295_vm3 = vcmp.eq.s32.totalorder %v232_v31, 1  ;;  %v314_v39 = vrot.slane %v256_v9, 7  ;;  %s683_s27 = scalar_lea.hbm %s682_s19, 1  ;;  %p688_p7 = scmp.lt.s32.totalorder %s682_s19, %s956_s2 }
  0x2b   : > { %v269_v14 = vmax.f32 %v267_v12, %v255_v8  ;;  %v270_v15 = vmax.f32 %v268_v13, %v256_v9  ;;  %v284_v37 = vsel %vm283_vm1, %v243_v4, %v282_v32  ;;  %vm311_vm4 = vcmp.eq.s32.totalorder %v232_v31, 2  ;;  %p684_p4 = scmp.ne.s32.totalorder %s682_s19, %s683_s27  ;;  %p689_p8 = scmp.lt.s32.totalorder %s687_s30, %s683_s27 }
  0x2c   : > { %v299_v38 = vsel %vm283_vm1, %v249_v6, %v298_v33  ;;  %v286_v43 = vsel %vm279_vm2, %v284_v37, 0.0  ;;  %v315_v47 = vsel %vm283_vm1, %v255_v8, %v314_v39  ;;  %v330_v48 = vrot.slane %v882_v11, 7 }
  0x2d   : > { %v885_v16 = vmax.f32 %v269_v14, %v880_v10  ;;  %v888_v17 = vmax.f32 %v270_v15, %v882_v11  ;;  %v301_v44 = vsel %vm295_vm3, %v299_v38, 0.0  ;;  %v317_v56 = vsel %vm311_vm4, %v315_v47, 0.0  ;;  %p685_p5 = pnand %p684_p4, %p822_p9  ;;  %p690_p10 = por %p689_p8, %p688_p7 }
  0x2e   : > { %v302_v52 = vadd.f32 %v301_v44, %v286_v43  ;;  %vm327_vm5 = vcmp.eq.s32.totalorder %v232_v31, 3  ;;  %v331_v59 = vsel %vm283_vm1, %v880_v10, %v330_v48 }
  0x2f   : > { %v273_v18 = vsub.f32 %v243_v4, %v885_v16  ;;  %v274_v19 = vsub.f32 %v244_v5, %v888_v17  ;;  %v287_v20 = vsub.f32 %v249_v6, %v885_v16  ;;  %v288_v21 = vsub.f32 %v250_v7, %v888_v17  ;;  %p686_p6 = pneg %p685_p5 }
  0x30   : > { %v303_v22 = vsub.f32 %v255_v8, %v885_v16  ;;  %v304_v23 = vsub.f32 %v256_v9, %v888_v17  ;;  %v319_v27 = vsub.f32 %v880_v10, %v885_v16  ;;  %v320_v29 = vsub.f32 %v882_v11, %v888_v17  ;;  %v348_v13 = vld [vmem:[#allocation2] sm:$0x3] }
  0x31   : > { %v275_v24 = vmul.f32 1.442695, %v273_v18  ;;  %v277_v25 = vmul.f32 1.442695, %v274_v19  ;;  %v289_v26 = vmul.f32 1.442695, %v287_v20  ;;  %v318_v61 = vadd.f32 %v317_v56, %v302_v52  ;;  %p691_p13 = pnand %p690_p10, %p686_p6 }
  0x32   : > { %v291_v28 = vmul.f32 1.442695, %v288_v21  ;;  %v305_v30 = vmul.f32 1.442695, %v303_v22  ;;  %v307_v34 = vmul.f32 1.442695, %v304_v23 }
  0x33   : > { %587 = vpow2.f32 %v275_v24  ;;  %v321_v35 = vmul.f32 1.442695, %v319_v27  ;;  %v323_v36 = vmul.f32 1.442695, %v320_v29  ;;  %v333_v62 = vsel %vm327_vm5, %v331_v59, 0.0 }
  0x34   : > { %589 = vpow2.f32 %v277_v25  ;;  %v334_v63 = vadd.f32 %v333_v62, %v318_v61 }
  0x35   : > { %591 = vpow2.f32 %v289_v26 }
  0x36   : > { %593 = vpow2.f32 %v291_v28  ;;  %v342_v6 = vperm.slane %v334_v63, 0  ;;  %v343_v7 = vperm.slane %v334_v63, 1  ;;  %v234_v28 = vand.u32 127, %v226_v0 }
  0x37   : > { %595 = vpow2.f32 %v305_v30 }
  0x38   : > { %597 = vpow2.f32 %v307_v34  ;;  %vm383_vm6 = vcmp.eq.s32.totalorder %v234_v28, 0 }
  0x39   : > { %v588_v40 = vpop.eup %587  ;;  %599 = vpow2.f32 %v321_v35 }
  0x3a   : > { %v590_v41 = vpop.eup %589  ;;  %601 = vpow2.f32 %v323_v36 }
  0x3b   : > { %v592_v42 = vpop.eup %591 }
  0x3c   : > { %v594_v45 = vpop.eup %593  ;;  %v293_v46 = vadd.f32 %v592_v42, %v588_v40 }
  0x3d   : > { %v596_v49 = vpop.eup %595  ;;  %v294_v50 = vadd.f32 %v594_v45, %v590_v41 }
  0x3e   : > { %v598_v51 = vpop.eup %597  ;;  %v309_v53 = vadd.f32 %v596_v49, %v293_v46 }
  0x3f   : > { %v600_v54 = vpop.eup %599  ;;  %v310_v55 = vadd.f32 %v598_v51, %v294_v50 }
  0x40   : > { %v602_v57 = vpop.eup %601  ;;  %v325_v58 = vadd.f32 %v600_v54, %v309_v53 }
  0x41   : > { %v326_v60 = vadd.f32 %v602_v57, %v310_v55 }
  0x42   : > { %603 = vlog2.f32 %v325_v58 }
  0x43   : > { %605 = vlog2.f32 %v326_v60 }
  0x48   : > { %v604_v2 = vpop.eup %603 }
  0x49   : > { %v606_v3 = vpop.eup %605  ;;  %v336_v4 = vmul.f32 0.6931472, %v604_v2 }
  0x4a   : > { %v338_v5 = vmul.f32 0.6931472, %v606_v3 }
  0x4b   : > { %v339_v8 = vadd.f32 %v336_v4, %v885_v16 }
  0x4c   : > { %v340_v9 = vadd.f32 %v338_v5, %v888_v17 }
  0x4d   : > { %v346_v11 = vsub.f32 %v339_v8, %v342_v6 }
  0x4e   : > { %v347_v12 = vsub.f32 %v340_v9, %v343_v7 }
  0x50   : > { %v353_v10 = vrot.slane %v347_v12, 7 }
  0x52   : > { %v354_v14 = vsel %vm283_vm1, %v346_v11, %v353_v10 }
  0x53   : > { %v356_v15 = vadd.f32 %v354_v14, %v348_v13 }
  0x55   : > { %361 = vst.msk [vmem:[#allocation2] sm:$0x3] %vm874_vm0, %v356_v15 }
  0x5c   : > { %v365_v18 = vld [vmem:[#allocation2] sm:$0x3] }
  0x5d   : > { %v367_v19 = vperm.slane %v365_v18, 0  ;;  %v368_v20 = vperm.slane %v365_v18, 1 }
  0x5f   : > { %v371_v21 = vsel %vm283_vm1, %v367_v19, 0.0  ;;  %v372_v16 = vsel %vm283_vm1, %v368_v20, 0.0 }
  0x60   : > { %v373_v17 = vadd.f32 %v372_v16, %v371_v21 }
  0x62   : > { %374 = vadd.xlane.f32.xlu0 %v373_v17 }
  0xd5   : > { %v375_v22 = vpop.xlane.xlu0 %374 }
  0xd6   : > { %v376_v23 = vrot.slane %v375_v22, 4 }
  0xd8   : > { %v377_v24 = vadd.f32 %v376_v23, %v375_v22 }
  0xda   : > { %v378_v25 = vrot.slane %v377_v24, 2 }
  0xdc   : > { %v379_v26 = vadd.f32 %v378_v25, %v377_v24 }
  0xde   : > { %v380_v27 = vrot.slane %v379_v26, 1 }
  0xe0   : > { %v381_v1 = vadd.f32 %v380_v27, %v379_v26 }
  0xe2   : > { %517 = vpush %v381_v1 }
 0x113   : > { %s518_s20 = spop %517 }
 0x114   : > { %v384_v29 = vstv %s518_s20 }
 0x115   : > { %v385_v30 = vsel %vm383_vm6, %v384_v29, 0.0 }
 0x116   : > { %386 = vst [vmem:[%s219_s15] sm:$0x1] %v385_v30 }
 0x117   : > { %694 = shalt.err (!%p691_p13)
}
 0x118   : > { %523 = dma.vmem_to_hbm [thread:$0]  (%p822_p9), %s399_s16, 16, %s401_s18, %s388_s26  }
 0x119 PF: > { %s412_s29 = sand.u32 1, %s733_s9   ;;  %p533_p0 = pnand %p505_p12, %p829_p11 }
 0x11a   : > { %s413_s25 = scalar_lea.sflag [#allocation5], %s412_s29 }
 0x11b   : > { %p534_p1 = pneg %p533_p0 }
 0x11d   : > { %728 = dma.done.wait (%p534_p1), %s413_s25, 16  }
 0x11e   : > { %730 = vsyncadd (%p534_p1), %s413_s25, 4294967280  ;;  %s21_s14 = sadd.s32 1, %s753_s14   ;;  %s964_s9 = smov %s737_s10 }
 0x11f   : > { %p18_p2 = scmp.ge.s32.totalorder %s21_s14, 4   ;;  %s965_s10 = smov %s741_s11 }
 0x120   : > { %s966_s11 = smov %s827_s23  ;;  %s967_s12 = smov %s749_s13 }
 0x121   : > { %s968_s13 = smov %s970_s17  ;;  %20 = sbr.rel (!%p18_p2) target bundleno = 8 (0x8), region = 94 }
 0x126   :  { %418 = vsyncpa [#allocation4], 1 }
 0x127   :  { %420 = vsyncpa [#allocation4 + $0x1], 1 }
 0x128   :  { %421 = vsyncpa [#allocation7], 1 }
 0x129   :  { %423 = vsyncpa [#allocation7 + $0x1], 1 }
 0x12a   :  { %424 = vsyncpa [#allocation5], 1 }
 0x12b   :  { %426 = vsyncpa [#allocation5 + $0x1], 1 }

</bundles_post_ra>
